<compile_context>
chip_gen: v6e
topology: v6e:2x2x1
jax: 0.10.0
libtpu: 0.0.40
codegen_flags: <defaults>
</compile_context>

<pallas_src>
import functools

import jax
import jax.numpy as jnp
from jax import lax
from jax.experimental import pallas as pl
from jax.experimental.pallas import tpu as pltpu


def basic_block_kernel(x_ref, masks_ref, w1_ref, b1_ref, w2_ref, b2_ref,
                       out_ref, taps_ref, *, C, W):
    """Single invocation, whole batch folded into the lane axis.

    x_ref    : (C, L)     input / residual, L = N*H*W
    masks_ref: (9, L)     {0,1} border masks per 3x3 tap (center row = ones)
    w1_ref   : (C, 9*C)   conv1 weights, BN1 scale folded, tap-major K layout
    b1_ref   : (C, 1)     folded BN1 bias
    w2_ref   : (C, 9*C)   conv2 weights, BN2 scale folded
    b2_ref   : (C, 1)     folded BN2 bias
    out_ref  : (C, L)
    taps_ref : (9*C, L)   VMEM scratch holding the stacked, pre-masked taps
    """
    x = x_ref[...]                              # (C, L) f32
    L = x.shape[1]

    # Load the host-precomputed masks once; static row slices are free.
    masks = masks_ref[...]                      # (9, L)
    mask_rows = [masks[t:t + 1, :] for t in range(9)]

    def conv3x3_stacked(inp, w_ref, b_ref):
        # Build the (9*C, L) stacked-tap operand in scratch, then one matmul.
        for kh in range(3):
            for kw in range(3):
                dh, dw = kh - 1, kw - 1
                t = kh * 3 + kw
                # tap[:, p] = inp[:, p + dh*W + dw]  (zero outside the image;
                # the mask also kills wraparound across image boundaries).
                amt = (-(dh * W + dw)) % L      # static, non-negative shift
                tap = pltpu.roll(inp, shift=amt, axis=1) if amt else inp
                if dh != 0 or dw != 0:
                    tap = tap * mask_rows[t]
                taps_ref[pl.ds(t * C, C), :] = tap
        # Single K = 9*C MXU matmul + per-channel (folded BN) bias.
        return jnp.dot(w_ref[...], taps_ref[...],
                       preferred_element_type=jnp.float32) + b_ref[...]

    # conv1 -> (folded) BN1 -> ReLU
    y1 = jnp.maximum(conv3x3_stacked(x, w1_ref, b1_ref), 0.0)
    # conv2 -> (folded) BN2 -> residual add -> ReLU
    y2 = conv3x3_stacked(y1, w2_ref, b2_ref)
    out_ref[...] = jnp.maximum(y2 + x, 0.0)


@jax.jit
def basic_block(x_nchw, w1, g1, be1, m1, v1, w2, g2, be2, m2, v2):
    """x_nchw: (N, C, H, W) float32.  Returns (N, C, H, W)."""
    eps = 1e-5
    # Fold BatchNorm (inference) into per-channel scale/bias.
    s1 = g1 / jnp.sqrt(v1 + eps)
    b1 = be1 - m1 * s1
    s2 = g2 / jnp.sqrt(v2 + eps)
    b2 = be2 - m2 * s2

    N, C, H, W = x_nchw.shape
    HW = H * W
    L = N * HW

    # (Cout, Cin, kh, kw) -> (Cout, kh, kw, Cin) -> (Cout, 9*Cin) with the BN
    # scale folded in, so column block t = kh*3+kw matches tap slot t of the
    # stacked operand.
    w1_s = jnp.transpose(w1 * s1[:, None, None, None], (0, 2, 3, 1))
    w1_s = w1_s.reshape(C, 9 * C).astype(jnp.float32)
    w2_s = jnp.transpose(w2 * s2[:, None, None, None], (0, 2, 3, 1))
    w2_s = w2_s.reshape(C, 9 * C).astype(jnp.float32)

    # Fold the batch into the lane axis: (N, C, H, W) -> (C, N*H*W).
    x = jnp.transpose(x_nchw, (1, 0, 2, 3)).reshape(C, L).astype(jnp.float32)

    # Host-precomputed {0,1} border masks, one row per 3x3 tap (row 4 = ones).
    pos = jnp.arange(L, dtype=jnp.int32)
    row = (pos % HW) // W
    col = pos % W
    mask_rows = []
    for kh in range(3):
        for kw in range(3):
            dh, dw = kh - 1, kw - 1
            m = jnp.ones((L,), jnp.float32)
            if dh == -1:
                m = m * (row >= 1).astype(jnp.float32)
            if dh == 1:
                m = m * (row <= H - 2).astype(jnp.float32)
            if dw == -1:
                m = m * (col >= 1).astype(jnp.float32)
            if dw == 1:
                m = m * (col <= W - 2).astype(jnp.float32)
            mask_rows.append(m)
    masks = jnp.stack(mask_rows, axis=0).astype(jnp.float32)   # (9, L)

    kernel = functools.partial(basic_block_kernel, C=C, W=W)
    out = pl.pallas_call(
        kernel,
        out_shape=jax.ShapeDtypeStruct((C, L), jnp.float32),
        grid_spec=pltpu.PrefetchScalarGridSpec(
            num_scalar_prefetch=0,
            grid=(1,),                                  # single step, whole batch
            in_specs=[
                pl.BlockSpec((C, L), lambda i: (0, 0)),        # x / residual
                pl.BlockSpec((9, L), lambda i: (0, 0)),        # border masks
                pl.BlockSpec((C, 9 * C), lambda i: (0, 0)),    # conv1 weights
                pl.BlockSpec((C, 1), lambda i: (0, 0)),        # bias1
                pl.BlockSpec((C, 9 * C), lambda i: (0, 0)),    # conv2 weights
                pl.BlockSpec((C, 1), lambda i: (0, 0)),        # bias2
            ],
            out_specs=pl.BlockSpec((C, L), lambda i: (0, 0)),
            scratch_shapes=[pltpu.VMEM((9 * C, L), jnp.float32)],
        ),
        compiler_params=pltpu.CompilerParams(
            dimension_semantics=("arbitrary",)),
    )(x, masks,
      w1_s, b1.reshape(C, 1).astype(jnp.float32),
      w2_s, b2.reshape(C, 1).astype(jnp.float32))

    return jnp.transpose(out.reshape(C, N, H, W), (1, 0, 2, 3))


def basic_block_reference(x_nchw, w1, g1, be1, m1, v1, w2, g2, be2, m2, v2):
    """Pure-JAX reference of the same forward pass (NCHW)."""
    eps = 1e-5

    def conv(x, w):
        return lax.conv_general_dilated(
            x, w, window_strides=(1, 1), padding=((1, 1), (1, 1)),
            dimension_numbers=("NCHW", "OIHW", "NCHW"))

    def bn(x, g, b, m, v):
        s = (g / jnp.sqrt(v + eps)).reshape(1, -1, 1, 1)
        o = (b - m * g / jnp.sqrt(v + eps)).reshape(1, -1, 1, 1)
        return x * s + o

    y = jax.nn.relu(bn(conv(x_nchw, w1), g1, be1, m1, v1))
    y = bn(conv(y, w2), g2, be2, m2, v2)
    return jax.nn.relu(y + x_nchw)


if __name__ == "__main__":
    key = jax.random.PRNGKey(0)
    N, C, H, W = 2, 8, 16, 16   # in_planes == planes, stride == 1

    ks = jax.random.split(key, 8)
    x = jax.random.normal(ks[0], (N, C, H, W), jnp.float32)

    w1 = jax.random.normal(ks[1], (C, C, 3, 3), jnp.float32) * 0.1
    w2 = jax.random.normal(ks[2], (C, C, 3, 3), jnp.float32) * 0.1

    # BatchNorm parameters (deterministic, non-trivial)
    g1 = 1.0 + 0.1 * jax.random.normal(ks[3], (C,), jnp.float32)
    be1 = 0.1 * jax.random.normal(ks[4], (C,), jnp.float32)
    m1 = 0.05 * jax.random.normal(ks[5], (C,), jnp.float32)
    v1 = 1.0 + 0.1 * jax.random.uniform(ks[6], (C,), jnp.float32)

    g2 = 1.0 - 0.05 * jax.random.normal(ks[7], (C,), jnp.float32)
    be2 = jnp.linspace(-0.1, 0.1, C, dtype=jnp.float32)
    m2 = jnp.linspace(0.0, 0.05, C, dtype=jnp.float32)
    v2 = jnp.linspace(0.9, 1.1, C, dtype=jnp.float32)

    args = (x, w1, g1, be1, m1, v1, w2, g2, be2, m2, v2)

    out = basic_block(*args)
    out = jax.block_until_ready(out)

    ref = basic_block_reference(*args)
    assert out.shape == (N, C, H, W)
    assert jnp.allclose(out, ref, atol=1e-4, rtol=1e-4), \
        f"max abs err {jnp.max(jnp.abs(out - ref))}"

    print("KERNEL_OK")
</pallas_src>

<mosaic_0001>
module attributes {stable_mosaic.version = 11 : i64} {
  func.func @basic_block_kernel(%arg0: i32, %arg1: memref<8x512xf32, #tpu.memory_space<vmem>>, %arg2: memref<9x512xf32, #tpu.memory_space<vmem>>, %arg3: memref<8x72xf32, #tpu.memory_space<vmem>>, %arg4: memref<8x1xf32, #tpu.memory_space<vmem>>, %arg5: memref<8x72xf32, #tpu.memory_space<vmem>>, %arg6: memref<8x1xf32, #tpu.memory_space<vmem>>, %arg7: memref<8x512xf32, #tpu.memory_space<vmem>>, %arg8: memref<72x512xf32, #tpu.memory_space<vmem>>) attributes {dimension_semantics = [#tpu.dimension_semantics<arbitrary>], iteration_bounds = array<i64: 1>, scalar_prefetch = 0 : i64, scratch_operands = 1 : i64, tpu.core_type = #tpu.core_type<tc>, window_params = [{pipeline_mode = #tpu.pipeline_mode<synchronous>, transform_indices = @transform_0, window_bounds = array<i64: 8, 512>}, {pipeline_mode = #tpu.pipeline_mode<synchronous>, transform_indices = @transform_1, window_bounds = array<i64: 9, 512>}, {pipeline_mode = #tpu.pipeline_mode<synchronous>, transform_indices = @transform_2, window_bounds = array<i64: 8, 72>}, {pipeline_mode = #tpu.pipeline_mode<synchronous>, transform_indices = @transform_3, window_bounds = array<i64: 8, 1>}, {pipeline_mode = #tpu.pipeline_mode<synchronous>, transform_indices = @transform_4, window_bounds = array<i64: 8, 72>}, {pipeline_mode = #tpu.pipeline_mode<synchronous>, transform_indices = @transform_5, window_bounds = array<i64: 8, 1>}, {pipeline_mode = #tpu.pipeline_mode<synchronous>, transform_indices = @transform_6, window_bounds = array<i64: 8, 512>}]} {
    %c0 = arith.constant 0 : index
    %c0_0 = arith.constant 0 : index
    %0 = vector.load %arg1[%c0, %c0_0] : memref<8x512xf32, #tpu.memory_space<vmem>>, vector<8x512xf32>
    %c0_1 = arith.constant 0 : index
    %c0_2 = arith.constant 0 : index
    %1 = vector.load %arg2[%c0_1, %c0_2] : memref<9x512xf32, #tpu.memory_space<vmem>>, vector<9x512xf32>
    %2 = vector.extract_strided_slice %1 {offsets = [0, 0], sizes = [1, 512], strides = [1, 1]} : vector<9x512xf32> to vector<1x512xf32>
    %3 = vector.extract_strided_slice %1 {offsets = [1, 0], sizes = [1, 512], strides = [1, 1]} : vector<9x512xf32> to vector<1x512xf32>
    %4 = vector.extract_strided_slice %1 {offsets = [2, 0], sizes = [1, 512], strides = [1, 1]} : vector<9x512xf32> to vector<1x512xf32>
    %5 = vector.extract_strided_slice %1 {offsets = [3, 0], sizes = [1, 512], strides = [1, 1]} : vector<9x512xf32> to vector<1x512xf32>
    %6 = vector.extract_strided_slice %1 {offsets = [5, 0], sizes = [1, 512], strides = [1, 1]} : vector<9x512xf32> to vector<1x512xf32>
    %7 = vector.extract_strided_slice %1 {offsets = [6, 0], sizes = [1, 512], strides = [1, 1]} : vector<9x512xf32> to vector<1x512xf32>
    %8 = vector.extract_strided_slice %1 {offsets = [7, 0], sizes = [1, 512], strides = [1, 1]} : vector<9x512xf32> to vector<1x512xf32>
    %9 = vector.extract_strided_slice %1 {offsets = [8, 0], sizes = [1, 512], strides = [1, 1]} : vector<9x512xf32> to vector<1x512xf32>
    %c17_i32 = arith.constant 17 : i32
    %10 = tpu.dynamic_rotate %0 by %c17_i32 dim 1 : vector<8x512xf32>, i32 -> vector<8x512xf32>
    %11 = vector.broadcast %2 : vector<1x512xf32> to vector<8x512xf32>
    %12 = arith.mulf %10, %11 : vector<8x512xf32>
    %c0_3 = arith.constant 0 : index
    %c0_4 = arith.constant 0 : index
    %13 = vector.load %arg8[%c0_3, %c0_4] : memref<72x512xf32, #tpu.memory_space<vmem>>, vector<8x512xf32>
    tpu.vector_store %arg8[%c0_3, %c0_4], %12 {strides = array<i32>} : memref<72x512xf32, #tpu.memory_space<vmem>>, vector<8x512xf32>,
    %c16_i32 = arith.constant 16 : i32
    %14 = tpu.dynamic_rotate %0 by %c16_i32 dim 1 : vector<8x512xf32>, i32 -> vector<8x512xf32>
    %15 = vector.broadcast %3 : vector<1x512xf32> to vector<8x512xf32>
    %16 = arith.mulf %14, %15 : vector<8x512xf32>
    %c8 = arith.constant 8 : index
    %c0_5 = arith.constant 0 : index
    %17 = vector.load %arg8[%c8, %c0_5] : memref<72x512xf32, #tpu.memory_space<vmem>>, vector<8x512xf32>
    tpu.vector_store %arg8[%c8, %c0_5], %16 {strides = array<i32>} : memref<72x512xf32, #tpu.memory_space<vmem>>, vector<8x512xf32>,
    %c15_i32 = arith.constant 15 : i32
    %18 = tpu.dynamic_rotate %0 by %c15_i32 dim 1 : vector<8x512xf32>, i32 -> vector<8x512xf32>
    %19 = vector.broadcast %4 : vector<1x512xf32> to vector<8x512xf32>
    %20 = arith.mulf %18, %19 : vector<8x512xf32>
    %c16 = arith.constant 16 : index
    %c0_6 = arith.constant 0 : index
    %21 = vector.load %arg8[%c16, %c0_6] : memref<72x512xf32, #tpu.memory_space<vmem>>, vector<8x512xf32>
    tpu.vector_store %arg8[%c16, %c0_6], %20 {strides = array<i32>} : memref<72x512xf32, #tpu.memory_space<vmem>>, vector<8x512xf32>,
    %c1_i32 = arith.constant 1 : i32
    %22 = tpu.dynamic_rotate %0 by %c1_i32 dim 1 : vector<8x512xf32>, i32 -> vector<8x512xf32>
    %23 = vector.broadcast %5 : vector<1x512xf32> to vector<8x512xf32>
    %24 = arith.mulf %22, %23 : vector<8x512xf32>
    %c24 = arith.constant 24 : index
    %c0_7 = arith.constant 0 : index
    %25 = vector.load %arg8[%c24, %c0_7] : memref<72x512xf32, #tpu.memory_space<vmem>>, vector<8x512xf32>
    tpu.vector_store %arg8[%c24, %c0_7], %24 {strides = array<i32>} : memref<72x512xf32, #tpu.memory_space<vmem>>, vector<8x512xf32>,
    %c32 = arith.constant 32 : index
    %c0_8 = arith.constant 0 : index
    %26 = vector.load %arg8[%c32, %c0_8] : memref<72x512xf32, #tpu.memory_space<vmem>>, vector<8x512xf32>
    tpu.vector_store %arg8[%c32, %c0_8], %0 {strides = array<i32>} : memref<72x512xf32, #tpu.memory_space<vmem>>, vector<8x512xf32>,
    %c511_i32 = arith.constant 511 : i32
    %27 = tpu.dynamic_rotate %0 by %c511_i32 dim 1 : vector<8x512xf32>, i32 -> vector<8x512xf32>
    %28 = vector.broadcast %6 : vector<1x512xf32> to vector<8x512xf32>
    %29 = arith.mulf %27, %28 : vector<8x512xf32>
    %c40 = arith.constant 40 : index
    %c0_9 = arith.constant 0 : index
    %30 = vector.load %arg8[%c40, %c0_9] : memref<72x512xf32, #tpu.memory_space<vmem>>, vector<8x512xf32>
    tpu.vector_store %arg8[%c40, %c0_9], %29 {strides = array<i32>} : memref<72x512xf32, #tpu.memory_space<vmem>>, vector<8x512xf32>,
    %c497_i32 = arith.constant 497 : i32
    %31 = tpu.dynamic_rotate %0 by %c497_i32 dim 1 : vector<8x512xf32>, i32 -> vector<8x512xf32>
    %32 = vector.broadcast %7 : vector<1x512xf32> to vector<8x512xf32>
    %33 = arith.mulf %31, %32 : vector<8x512xf32>
    %c48 = arith.constant 48 : index
    %c0_10 = arith.constant 0 : index
    %34 = vector.load %arg8[%c48, %c0_10] : memref<72x512xf32, #tpu.memory_space<vmem>>, vector<8x512xf32>
    tpu.vector_store %arg8[%c48, %c0_10], %33 {strides = array<i32>} : memref<72x512xf32, #tpu.memory_space<vmem>>, vector<8x512xf32>,
    %c496_i32 = arith.constant 496 : i32
    %35 = tpu.dynamic_rotate %0 by %c496_i32 dim 1 : vector<8x512xf32>, i32 -> vector<8x512xf32>
    %36 = vector.broadcast %8 : vector<1x512xf32> to vector<8x512xf32>
    %37 = arith.mulf %35, %36 : vector<8x512xf32>
    %c56 = arith.constant 56 : index
    %c0_11 = arith.constant 0 : index
    %38 = vector.load %arg8[%c56, %c0_11] : memref<72x512xf32, #tpu.memory_space<vmem>>, vector<8x512xf32>
    tpu.vector_store %arg8[%c56, %c0_11], %37 {strides = array<i32>} : memref<72x512xf32, #tpu.memory_space<vmem>>, vector<8x512xf32>,
    %c495_i32 = arith.constant 495 : i32
    %39 = tpu.dynamic_rotate %0 by %c495_i32 dim 1 : vector<8x512xf32>, i32 -> vector<8x512xf32>
    %40 = vector.broadcast %9 : vector<1x512xf32> to vector<8x512xf32>
    %41 = arith.mulf %39, %40 : vector<8x512xf32>
    %c64 = arith.constant 64 : index
    %c0_12 = arith.constant 0 : index
    %42 = vector.load %arg8[%c64, %c0_12] : memref<72x512xf32, #tpu.memory_space<vmem>>, vector<8x512xf32>
    tpu.vector_store %arg8[%c64, %c0_12], %41 {strides = array<i32>} : memref<72x512xf32, #tpu.memory_space<vmem>>, vector<8x512xf32>,
    %c0_13 = arith.constant 0 : index
    %c0_14 = arith.constant 0 : index
    %43 = vector.load %arg3[%c0_13, %c0_14] : memref<8x72xf32, #tpu.memory_space<vmem>>, vector<8x72xf32>
    %c0_15 = arith.constant 0 : index
    %c0_16 = arith.constant 0 : index
    %44 = vector.load %arg8[%c0_15, %c0_16] : memref<72x512xf32, #tpu.memory_space<vmem>>, vector<72x512xf32>
    %cst = arith.constant dense<0.000000e+00> : vector<8x512xf32>
    %45 = tpu.matmul %43, %44, %cst {dimension_numbers = #tpu.dot_dimension_numbers<[1], [0], [0], [1], [0, 0, 1, 1], [], []>} : vector<8x72xf32>, vector<72x512xf32>, vector<8x512xf32> -> vector<8x512xf32>
    %c0_17 = arith.constant 0 : index
    %c0_18 = arith.constant 0 : index
    %46 = vector.load %arg4[%c0_17, %c0_18] : memref<8x1xf32, #tpu.memory_space<vmem>>, vector<8x1xf32>
    %47 = vector.broadcast %46 : vector<8x1xf32> to vector<8x512xf32>
    %48 = arith.addf %45, %47 : vector<8x512xf32>
    %cst_19 = arith.constant 0.000000e+00 : f32
    %49 = vector.broadcast %cst_19 : f32 to vector<8x512xf32>
    %50 = arith.maximumf %48, %49 : vector<8x512xf32>
    %c17_i32_20 = arith.constant 17 : i32
    %51 = tpu.dynamic_rotate %50 by %c17_i32_20 dim 1 : vector<8x512xf32>, i32 -> vector<8x512xf32>
    %52 = vector.broadcast %2 : vector<1x512xf32> to vector<8x512xf32>
    %53 = arith.mulf %51, %52 : vector<8x512xf32>
    %c0_21 = arith.constant 0 : index
    %c0_22 = arith.constant 0 : index
    %54 = vector.load %arg8[%c0_21, %c0_22] : memref<72x512xf32, #tpu.memory_space<vmem>>, vector<8x512xf32>
    tpu.vector_store %arg8[%c0_21, %c0_22], %53 {strides = array<i32>} : memref<72x512xf32, #tpu.memory_space<vmem>>, vector<8x512xf32>,
    %c16_i32_23 = arith.constant 16 : i32
    %55 = tpu.dynamic_rotate %50 by %c16_i32_23 dim 1 : vector<8x512xf32>, i32 -> vector<8x512xf32>
    %56 = vector.broadcast %3 : vector<1x512xf32> to vector<8x512xf32>
    %57 = arith.mulf %55, %56 : vector<8x512xf32>
    %c8_24 = arith.constant 8 : index
    %c0_25 = arith.constant 0 : index
    %58 = vector.load %arg8[%c8_24, %c0_25] : memref<72x512xf32, #tpu.memory_space<vmem>>, vector<8x512xf32>
    tpu.vector_store %arg8[%c8_24, %c0_25], %57 {strides = array<i32>} : memref<72x512xf32, #tpu.memory_space<vmem>>, vector<8x512xf32>,
    %c15_i32_26 = arith.constant 15 : i32
    %59 = tpu.dynamic_rotate %50 by %c15_i32_26 dim 1 : vector<8x512xf32>, i32 -> vector<8x512xf32>
    %60 = vector.broadcast %4 : vector<1x512xf32> to vector<8x512xf32>
    %61 = arith.mulf %59, %60 : vector<8x512xf32>
    %c16_27 = arith.constant 16 : index
    %c0_28 = arith.constant 0 : index
    %62 = vector.load %arg8[%c16_27, %c0_28] : memref<72x512xf32, #tpu.memory_space<vmem>>, vector<8x512xf32>
    tpu.vector_store %arg8[%c16_27, %c0_28], %61 {strides = array<i32>} : memref<72x512xf32, #tpu.memory_space<vmem>>, vector<8x512xf32>,
    %c1_i32_29 = arith.constant 1 : i32
    %63 = tpu.dynamic_rotate %50 by %c1_i32_29 dim 1 : vector<8x512xf32>, i32 -> vector<8x512xf32>
    %64 = vector.broadcast %5 : vector<1x512xf32> to vector<8x512xf32>
    %65 = arith.mulf %63, %64 : vector<8x512xf32>
    %c24_30 = arith.constant 24 : index
    %c0_31 = arith.constant 0 : index
    %66 = vector.load %arg8[%c24_30, %c0_31] : memref<72x512xf32, #tpu.memory_space<vmem>>, vector<8x512xf32>
    tpu.vector_store %arg8[%c24_30, %c0_31], %65 {strides = array<i32>} : memref<72x512xf32, #tpu.memory_space<vmem>>, vector<8x512xf32>,
    %c32_32 = arith.constant 32 : index
    %c0_33 = arith.constant 0 : index
    %67 = vector.load %arg8[%c32_32, %c0_33] : memref<72x512xf32, #tpu.memory_space<vmem>>, vector<8x512xf32>
    tpu.vector_store %arg8[%c32_32, %c0_33], %50 {strides = array<i32>} : memref<72x512xf32, #tpu.memory_space<vmem>>, vector<8x512xf32>,
    %c511_i32_34 = arith.constant 511 : i32
    %68 = tpu.dynamic_rotate %50 by %c511_i32_34 dim 1 : vector<8x512xf32>, i32 -> vector<8x512xf32>
    %69 = vector.broadcast %6 : vector<1x512xf32> to vector<8x512xf32>
    %70 = arith.mulf %68, %69 : vector<8x512xf32>
    %c40_35 = arith.constant 40 : index
    %c0_36 = arith.constant 0 : index
    %71 = vector.load %arg8[%c40_35, %c0_36] : memref<72x512xf32, #tpu.memory_space<vmem>>, vector<8x512xf32>
    tpu.vector_store %arg8[%c40_35, %c0_36], %70 {strides = array<i32>} : memref<72x512xf32, #tpu.memory_space<vmem>>, vector<8x512xf32>,
    %c497_i32_37 = arith.constant 497 : i32
    %72 = tpu.dynamic_rotate %50 by %c497_i32_37 dim 1 : vector<8x512xf32>, i32 -> vector<8x512xf32>
    %73 = vector.broadcast %7 : vector<1x512xf32> to vector<8x512xf32>
    %74 = arith.mulf %72, %73 : vector<8x512xf32>
    %c48_38 = arith.constant 48 : index
    %c0_39 = arith.constant 0 : index
    %75 = vector.load %arg8[%c48_38, %c0_39] : memref<72x512xf32, #tpu.memory_space<vmem>>, vector<8x512xf32>
    tpu.vector_store %arg8[%c48_38, %c0_39], %74 {strides = array<i32>} : memref<72x512xf32, #tpu.memory_space<vmem>>, vector<8x512xf32>,
    %c496_i32_40 = arith.constant 496 : i32
    %76 = tpu.dynamic_rotate %50 by %c496_i32_40 dim 1 : vector<8x512xf32>, i32 -> vector<8x512xf32>
    %77 = vector.broadcast %8 : vector<1x512xf32> to vector<8x512xf32>
    %78 = arith.mulf %76, %77 : vector<8x512xf32>
    %c56_41 = arith.constant 56 : index
    %c0_42 = arith.constant 0 : index
    %79 = vector.load %arg8[%c56_41, %c0_42] : memref<72x512xf32, #tpu.memory_space<vmem>>, vector<8x512xf32>
    tpu.vector_store %arg8[%c56_41, %c0_42], %78 {strides = array<i32>} : memref<72x512xf32, #tpu.memory_space<vmem>>, vector<8x512xf32>,
    %c495_i32_43 = arith.constant 495 : i32
    %80 = tpu.dynamic_rotate %50 by %c495_i32_43 dim 1 : vector<8x512xf32>, i32 -> vector<8x512xf32>
    %81 = vector.broadcast %9 : vector<1x512xf32> to vector<8x512xf32>
    %82 = arith.mulf %80, %81 : vector<8x512xf32>
    %c64_44 = arith.constant 64 : index
    %c0_45 = arith.constant 0 : index
    %83 = vector.load %arg8[%c64_44, %c0_45] : memref<72x512xf32, #tpu.memory_space<vmem>>, vector<8x512xf32>
    tpu.vector_store %arg8[%c64_44, %c0_45], %82 {strides = array<i32>} : memref<72x512xf32, #tpu.memory_space<vmem>>, vector<8x512xf32>,
    %c0_46 = arith.constant 0 : index
    %c0_47 = arith.constant 0 : index
    %84 = vector.load %arg5[%c0_46, %c0_47] : memref<8x72xf32, #tpu.memory_space<vmem>>, vector<8x72xf32>
    %c0_48 = arith.constant 0 : index
    %c0_49 = arith.constant 0 : index
    %85 = vector.load %arg8[%c0_48, %c0_49] : memref<72x512xf32, #tpu.memory_space<vmem>>, vector<72x512xf32>
    %cst_50 = arith.constant dense<0.000000e+00> : vector<8x512xf32>
    %86 = tpu.matmul %84, %85, %cst_50 {dimension_numbers = #tpu.dot_dimension_numbers<[1], [0], [0], [1], [0, 0, 1, 1], [], []>} : vector<8x72xf32>, vector<72x512xf32>, vector<8x512xf32> -> vector<8x512xf32>
    %c0_51 = arith.constant 0 : index
    %c0_52 = arith.constant 0 : index
    %87 = vector.load %arg6[%c0_51, %c0_52] : memref<8x1xf32, #tpu.memory_space<vmem>>, vector<8x1xf32>
    %88 = vector.broadcast %87 : vector<8x1xf32> to vector<8x512xf32>
    %89 = arith.addf %86, %88 : vector<8x512xf32>
    %90 = arith.addf %89, %0 : vector<8x512xf32>
    %cst_53 = arith.constant 0.000000e+00 : f32
    %91 = vector.broadcast %cst_53 : f32 to vector<8x512xf32>
    %92 = arith.maximumf %90, %91 : vector<8x512xf32>
    %c0_54 = arith.constant 0 : index
    %c0_55 = arith.constant 0 : index
    %93 = vector.load %arg7[%c0_54, %c0_55] : memref<8x512xf32, #tpu.memory_space<vmem>>, vector<8x512xf32>
    tpu.vector_store %arg7[%c0_54, %c0_55], %92 {strides = array<i32>} : memref<8x512xf32, #tpu.memory_space<vmem>>, vector<8x512xf32>,
    return
  }
  func.func @transform_0(%arg0: i32) -> (i32, i32) {
    %c0_i32 = arith.constant 0 : i32
    %c0_i32_0 = arith.constant 0 : i32
    %c0_i32_1 = arith.constant 0 : i32
    return %c0_i32, %c0_i32_0 : i32, i32
  }
  func.func @transform_1(%arg0: i32) -> (i32, i32) {
    %c0_i32 = arith.constant 0 : i32
    %c0_i32_0 = arith.constant 0 : i32
    %c0_i32_1 = arith.constant 0 : i32
    return %c0_i32, %c0_i32_0 : i32, i32
  }
  func.func @transform_2(%arg0: i32) -> (i32, i32) {
    %c0_i32 = arith.constant 0 : i32
    %c0_i32_0 = arith.constant 0 : i32
    %c0_i32_1 = arith.constant 0 : i32
    return %c0_i32, %c0_i32_0 : i32, i32
  }
  func.func @transform_3(%arg0: i32) -> (i32, i32) {
    %c0_i32 = arith.constant 0 : i32
    %c0_i32_0 = arith.constant 0 : i32
    %c0_i32_1 = arith.constant 0 : i32
    return %c0_i32, %c0_i32_0 : i32, i32
  }
  func.func @transform_4(%arg0: i32) -> (i32, i32) {
    %c0_i32 = arith.constant 0 : i32
    %c0_i32_0 = arith.constant 0 : i32
    %c0_i32_1 = arith.constant 0 : i32
    return %c0_i32, %c0_i32_0 : i32, i32
  }
  func.func @transform_5(%arg0: i32) -> (i32, i32) {
    %c0_i32 = arith.constant 0 : i32
    %c0_i32_0 = arith.constant 0 : i32
    %c0_i32_1 = arith.constant 0 : i32
    return %c0_i32, %c0_i32_0 : i32, i32
  }
  func.func @transform_6(%arg0: i32) -> (i32, i32) {
    %c0_i32 = arith.constant 0 : i32
    %c0_i32_0 = arith.constant 0 : i32
    %c0_i32_1 = arith.constant 0 : i32
    return %c0_i32, %c0_i32_0 : i32, i32
  }
}

</mosaic_0001>

<bundles_post_ra>
// kernel: basic_block.1
= control target key start
LH: loop header
LB: loop body
LE: loop exit
PB: predicated region body
PF: predicated region fallthrough
CT: control target
= control target key end

     0   :  { %s917_s25 = smov 111   ;;  %s918_s30 = smov 112   ;;  %v924_v4 = vmov 0.0   ;;  %v925_v5 = vmov 0   ;;  %v43_v7 = vlaneseq  ;;  %vm380_vm8 = vcmask 588800   ;;  %s1497_s0 = inlined_call_operand.vmem [shape: f32[8,512], index: 0, kind: input, shape index: {}]   ;;  %s1498_s3 = inlined_call_operand.vmem [shape: f32[8,1], index: 3, kind: input, shape index: {}]   ;;  %s1499_s1 = inlined_call_operand.vmem [shape: f32[9,512], index: 1, kind: input, shape index: {}]   ;;  %s1500_s2 = inlined_call_operand.vmem [shape: f32[8,72], index: 2, kind: input, shape index: {}]   ;;  %s1501_s5 = inlined_call_operand.vmem [shape: f32[8,1], index: 5, kind: input, shape index: {}]   ;;  %s1502_s4 = inlined_call_operand.vmem [shape: f32[8,72], index: 4, kind: input, shape index: {}]   ;;  %s1503_s6 = inlined_call_operand.vmem [shape: f32[8,512], index: 6, kind: output, shape index: {}]  }
   0x1   :  { %v965_v0 = vld [vmem:[%s1497_s0 + $0x10] sm:$0xff]  ;;  %v970_v1 = vld [vmem:[%s1497_s0] sm:$0xff]  ;;  %v979_v2 = vld [vmem:[%s1497_s0 + $0x18] sm:$0xff]  ;;  %s920_s7 = smov 127   ;;  %s921_s8 = smov 1   ;;  %448 = vmatprep.mubr.f32.mxu0 %v924_v4  ;;  %519 = vmatprep.mubr.f32.mxu1 %v924_v4 }
   0x2   :  { %304 = vrot.lane.b32.xlu1 %v965_v0, %s917_s25  ;;  %300 = vrot.lane.b32.xlu0 %v970_v1, %s917_s25  ;;  %v984_v3 = vld [vmem:[%s1497_s0 + $0x8] sm:$0xff]  ;;  %s919_s0 = smov 113   ;;  %s922_s9 = smov 15   ;;  %v374_v6 = vld [vmem:[%s1498_s3] sm:$0xff]  ;;  %v1051_v8 = vand.u32 127, %v43_v7  ;;  %v1064_v13 = vshrl.u32 %v43_v7, 7 }
   0x3   :  { %s923_s10 = smov 16   ;;  %916 = vset.pattern.permute.xlu0 %v925_v5  ;;  %s926_s11 = smov 17   ;;  %v1057_v11 = vld [vmem:[%s1499_s1 + $0x28] ss:$0 sm:$0xff]  ;;  %v1062_v12 = vld [vmem:[%s1499_s1 + $0x38] ss:$0 sm:$0xff] }
   0x4   :  { %vm308_vm0 = vcmp.lt.s32.totalorder %v1051_v8, 111  ;;  %v1069_v14 = vld [vmem:[%s1499_s1 + $0x20] ss:$0 sm:$0xff]  ;;  %v1074_v15 = vld [vmem:[%s1499_s1 + $0x30] ss:$0 sm:$0xff]  ;;  %v278_v26 = vsub.s32 7, %v1064_v13 }
   0x5   :  { %v1092_v27 = vld [vmem:[%s1499_s1 + $0x18] sm:$0xff]  ;;  %v1097_v28 = vld [vmem:[%s1499_s1 + $0x8] sm:$0xff]  ;;  %v1102_v29 = vld [vmem:[%s1499_s1 + $0x10] sm:$0xff]  ;;  %vm271_vm1 = vcmp.lt.s32.totalorder %v1051_v8, 112  ;;  %v241_v47 = vsub.s32 6, %v1064_v13  ;;  %vm234_vm2 = vcmp.lt.s32.totalorder %v1051_v8, 113 }
   0x6   :  { %306 = vrot.lane.b32.xlu1 %v979_v2, %s917_s25  ;;  %302 = vrot.lane.b32.xlu0 %v984_v3, %s917_s25  ;;  %v1107_v31 = vld [vmem:[%s1499_s1] sm:$0xff]  ;;  %v1111_v33 = vrot.slane %v1092_v27, %v278_v26  ;;  %v1114_v34 = vrot.slane %v1097_v28, %v278_v26  ;;  %v1117_v35 = vrot.slane %v1102_v29, %v278_v26  ;;  %v204_v5 = vsub.s32 5, %v1064_v13 }
   0x7   :  { %v1120_v36 = vrot.slane %v1107_v31, %v278_v26  ;;  %v1137_v50 = vrot.slane %v1092_v27, %v241_v47  ;;  %v1140_v51 = vrot.slane %v1097_v28, %v241_v47  ;;  %v1143_v52 = vrot.slane %v1102_v29, %v241_v47 }
   0x8   :  { %v1146_v53 = vrot.slane %v1107_v31, %v241_v47  ;;  %vm197_vm3 = vcmp.lt.s32.totalorder %v1051_v8, 127  ;;  %vm156_vm4 = vcmp.lt.s32.totalorder %v1051_v8, 1  ;;  %vm119_vm5 = vcmp.lt.s32.totalorder %v1051_v8, 15 }
   0x9   :  { %vm82_vm6 = vcmp.lt.s32.totalorder %v1051_v8, 16  ;;  %vm45_vm7 = vcmp.lt.s32.totalorder %v1051_v8, 17 }
   0xa   :  { %265 = vrot.lane.b32.xlu1 %v984_v3, %s918_s30  ;;  %263 = vrot.lane.b32.xlu0 %v970_v1, %s918_s30 }
   0xe   :  { %269 = vrot.lane.b32.xlu1 %v979_v2, %s918_s30  ;;  %267 = vrot.lane.b32.xlu0 %v965_v0, %s918_s30 }
  0x12   :  { %228 = vrot.lane.b32.xlu1 %v984_v3, %s919_s0  ;;  %226 = vrot.lane.b32.xlu0 %v970_v1, %s919_s0 }
  0x16   :  { %232 = vrot.lane.b32.xlu1 %v979_v2, %s919_s0  ;;  %230 = vrot.lane.b32.xlu0 %v965_v0, %s919_s0 }
  0x1a   :  { %191 = vrot.lane.b32.xlu1 %v984_v3, %s920_s7  ;;  %189 = vrot.lane.b32.xlu0 %v970_v1, %s920_s7 }
  0x1e   :  { %195 = vrot.lane.b32.xlu1 %v979_v2, %s920_s7  ;;  %193 = vrot.lane.b32.xlu0 %v965_v0, %s920_s7 }
  0x22   :  { %150 = vrot.lane.b32.xlu1 %v984_v3, %s921_s8  ;;  %148 = vrot.lane.b32.xlu0 %v970_v1, %s921_s8 }
  0x26   :  { %154 = vrot.lane.b32.xlu1 %v979_v2, %s921_s8  ;;  %152 = vrot.lane.b32.xlu0 %v965_v0, %s921_s8 }
  0x2a   :  { %113 = vrot.lane.b32.xlu1 %v984_v3, %s922_s9  ;;  %111 = vrot.lane.b32.xlu0 %v970_v1, %s922_s9 }
  0x2e   :  { %117 = vrot.lane.b32.xlu1 %v979_v2, %s922_s9  ;;  %115 = vrot.lane.b32.xlu0 %v965_v0, %s922_s9 }
  0x32   :  { %76 = vrot.lane.b32.xlu1 %v984_v3, %s923_s10  ;;  %74 = vrot.lane.b32.xlu0 %v970_v1, %s923_s10 }
  0x36   :  { %80 = vrot.lane.b32.xlu1 %v979_v2, %s923_s10  ;;  %78 = vrot.lane.b32.xlu0 %v965_v0, %s923_s10 }
  0x3a   :  { %37 = vrot.lane.b32.xlu1 %v984_v3, %s926_s11  ;;  %35 = vrot.lane.b32.xlu0 %v970_v1, %s926_s11 }
  0x3e   :  { %41 = vrot.lane.b32.xlu1 %v979_v2, %s926_s11  ;;  %39 = vrot.lane.b32.xlu0 %v965_v0, %s926_s11 }
  0x42   :  { %377 = vperm.xlu0 %916, %v374_v6  }
  0x74   :  { %v305_v9 = vpop.permute.xlu1 %304  ;;  %v301_v10 = vpop.permute.xlu0 %300 }
  0x78   :  { %v307_v16 = vpop.permute.xlu1 %306  ;;  %v303_v17 = vpop.permute.xlu0 %302 }
  0x79   :  { %v309_v18 = vsel %vm308_vm0, %v305_v9, %v307_v16  ;;  %v311_v19 = vsel %vm308_vm0, %v301_v10, %v303_v17  ;;  %v310_v20 = vsel %vm308_vm0, %v303_v17, %v305_v9  ;;  %v312_v21 = vsel %vm308_vm0, %v307_v16, %v301_v10 }
  0x7a   :  { %v330_v22 = vmul.f32 %v1057_v11, %v310_v20  ;;  %v332_v23 = vmul.f32 %v1062_v12, %v312_v21  ;;  %v329_v24 = vmul.f32 %v1069_v14, %v311_v19  ;;  %v331_v25 = vmul.f32 %v1074_v15, %v309_v18 }
  0x7b   :  { %v1163_v9 = vrot.slane %v1092_v27, %v204_v5  ;;  %v1166_v10 = vrot.slane %v1097_v28, %v204_v5  ;;  %v1169_v16 = vrot.slane %v1102_v29, %v204_v5  ;;  %v163_v17 = vsub.s32 3, %v1064_v13 }
  0x7c   :  { %v266_v30 = vpop.permute.xlu1 %265  ;;  %398 = vmatprep.subr.mxu0 %v330_v22  ;;  %469 = vmatprep.subr.mxu1 %v332_v23  ;;  %v264_v32 = vpop.permute.xlu0 %263  ;;  %v1173_v18 = vrot.slane %v1107_v31, %v204_v5 }
  0x7d   :  { %399 = vmatpush1.msra.mxu0 %v329_v24  ;;  %470 = vmatpush1.msra.mxu1 %v331_v25  ;;  %v274_v37 = vsel %vm271_vm1, %v264_v32, %v266_v30 }
  0x7e   :  { %v292_v46 = vmul.f32 %v1120_v36, %v274_v37 }
  0x80   :  { %v270_v38 = vpop.permute.xlu1 %269  ;;  %v268_v39 = vpop.permute.xlu0 %267 }
  0x81   :  { %v275_v40 = vsel %vm271_vm1, %v270_v38, %v264_v32  ;;  %v272_v41 = vsel %vm271_vm1, %v268_v39, %v270_v38  ;;  %v273_v42 = vsel %vm271_vm1, %v266_v30, %v268_v39  ;;  %v1188_v32 = vrot.slane %v1097_v28, %v163_v17 }
  0x82   :  { %v295_v43 = vmul.f32 %v1111_v33, %v275_v40  ;;  %v293_v44 = vmul.f32 %v1114_v34, %v273_v42  ;;  %v294_v45 = vmul.f32 %v1117_v35, %v272_v41  ;;  %v1194_v41 = vrot.slane %v1107_v31, %v163_v17 }
  0x84   :  { %v229_v48 = vpop.permute.xlu1 %228  ;;  %400 = vmatprep.subr.mxu0 %v293_v44  ;;  %471 = vmatprep.subr.mxu1 %v295_v43  ;;  %v227_v49 = vpop.permute.xlu0 %226  ;;  %v1199_v43 = vrot.slane %v1102_v29, %v163_v17  ;;  %v1202_v44 = vrot.slane %v1092_v27, %v163_v17 }
  0x85   :  { %401 = vmatpush1.msra.mxu0 %v292_v46  ;;  %472 = vmatpush1.msra.mxu1 %v294_v45  ;;  %v237_v54 = vsel %vm234_vm2, %v227_v49, %v229_v48  ;;  %v126_v45 = vsub.s32 2, %v1064_v13 }
  0x86   :  { %v255_v63 = vmul.f32 %v1146_v53, %v237_v54 }
  0x87   :  { %v1228_v5 = vrot.slane %v1102_v29, %v126_v45 }
  0x88   :  { %v233_v55 = vpop.permute.xlu1 %232  ;;  %v231_v56 = vpop.permute.xlu0 %230 }
  0x89   :  { %v238_v57 = vsel %vm234_vm2, %v233_v55, %v227_v49  ;;  %v235_v58 = vsel %vm234_vm2, %v231_v56, %v233_v55  ;;  %v236_v59 = vsel %vm234_vm2, %v229_v48, %v231_v56 }
  0x8a   :  { %v258_v60 = vmul.f32 %v1137_v50, %v238_v57  ;;  %v256_v61 = vmul.f32 %v1140_v51, %v236_v59  ;;  %v257_v62 = vmul.f32 %v1143_v52, %v235_v58  ;;  %v1219_v58 = vrot.slane %v1097_v28, %v126_v45 }
  0x8c   :  { %v192_v6 = vpop.permute.xlu1 %191  ;;  %402 = vmatprep.subr.mxu0 %v256_v61  ;;  %473 = vmatprep.subr.mxu1 %v258_v60  ;;  %v190_v7 = vpop.permute.xlu0 %189 }
  0x8d   :  { %403 = vmatpush1.msra.mxu0 %v255_v63  ;;  %474 = vmatpush1.msra.mxu1 %v257_v62  ;;  %v200_v19 = vsel %vm197_vm3, %v190_v7, %v192_v6  ;;  %v1224_v62 = vrot.slane %v1107_v31, %v126_v45 }
  0x8e   :  { %v218_v37 = vmul.f32 %v1173_v18, %v200_v19 }
  0x90   :  { %v196_v20 = vpop.permute.xlu1 %195  ;;  %v194_v21 = vpop.permute.xlu0 %193 }
  0x91   :  { %v201_v22 = vsel %vm197_vm3, %v196_v20, %v190_v7  ;;  %v198_v23 = vsel %vm197_vm3, %v194_v21, %v196_v20  ;;  %v199_v24 = vsel %vm197_vm3, %v192_v6, %v194_v21  ;;  %v1231_v6 = vrot.slane %v1092_v27, %v126_v45 }
  0x92   :  { %v221_v25 = vmul.f32 %v1163_v9, %v201_v22  ;;  %v219_v26 = vmul.f32 %v1166_v10, %v199_v24  ;;  %v220_v30 = vmul.f32 %v1169_v16, %v198_v23  ;;  %v89_v7 = vsub.s32 1, %v1064_v13 }
  0x94   :  { %v151_v38 = vpop.permute.xlu1 %150  ;;  %404 = vmatprep.subr.mxu0 %v219_v26  ;;  %475 = vmatprep.subr.mxu1 %v221_v25  ;;  %v149_v39 = vpop.permute.xlu0 %148  ;;  %v1245_v26 = vrot.slane %v1097_v28, %v89_v7  ;;  %v1257_v45 = vrot.slane %v1092_v27, %v89_v7 }
  0x95   :  { %v159_v40 = vsel %vm156_vm4, %v149_v39, %v151_v38  ;;  %405 = vmatpush1.msra.mxu0 %v218_v37  ;;  %476 = vmatpush1.msra.mxu1 %v220_v30 }
  0x96   :  { %v178_v42 = vmul.f32 %v1188_v32, %v159_v40  ;;  %406 = vmatprep.subr.mxu0 %v984_v3  ;;  %477 = vmatprep.subr.mxu1 %v979_v2 }
  0x97   :  { %407 = vmatpush1.msra.mxu0 %v970_v1  ;;  %478 = vmatpush1.msra.mxu1 %v965_v0 }
  0x98   :  { %v155_v46 = vpop.permute.xlu1 %154  ;;  %408 = vmatprep.subr.mxu0 %v178_v42  ;;  %v153_v47 = vpop.permute.xlu0 %152  ;;  %v1254_v42 = vrot.slane %v1102_v29, %v89_v7 }
  0x99   :  { %v160_v48 = vsel %vm156_vm4, %v155_v46, %v149_v39  ;;  %v157_v49 = vsel %vm156_vm4, %v153_v47, %v155_v46  ;;  %v158_v54 = vsel %vm156_vm4, %v151_v38, %v153_v47  ;;  %v1250_v39 = vrot.slane %v1107_v31, %v89_v7 }
  0x9a   :  { %v177_v55 = vmul.f32 %v1194_v41, %v160_v48  ;;  %v179_v56 = vmul.f32 %v1199_v43, %v158_v54  ;;  %v180_v57 = vmul.f32 %v1202_v44, %v157_v49  ;;  %v52_v46 = vsub.s32 0, %v1064_v13 }
  0x9c   :  { %v114_v59 = vpop.permute.xlu1 %113  ;;  %409 = vmatpush1.msra.mxu0 %v177_v55  ;;  %479 = vmatprep.subr.mxu1 %v180_v57  ;;  %v112_v60 = vpop.permute.xlu0 %111 }
  0x9d   :  { %v122_v61 = vsel %vm119_vm5, %v112_v60, %v114_v59  ;;  %480 = vmatpush1.msra.mxu1 %v179_v56 }
  0x9e   :  { %v141_v63 = vmul.f32 %v1219_v58, %v122_v61 }
  0xa0   :  { %v118_v17 = vpop.permute.xlu1 %117  ;;  %410 = vmatprep.subr.mxu0 %v141_v63  ;;  %v116_v19 = vpop.permute.xlu0 %115 }
  0xa1   :  { %v123_v20 = vsel %vm119_vm5, %v118_v17, %v112_v60  ;;  %v120_v21 = vsel %vm119_vm5, %v116_v19, %v118_v17  ;;  %v121_v22 = vsel %vm119_vm5, %v114_v59, %v116_v19  ;;  %v1271_v59 = vrot.slane %v1097_v28, %v52_v46 }
  0xa2   :  { %v140_v23 = vmul.f32 %v1224_v62, %v123_v20  ;;  %v142_v24 = vmul.f32 %v1228_v5, %v121_v22  ;;  %v143_v25 = vmul.f32 %v1231_v6, %v120_v21  ;;  %v1277_v17 = vrot.slane %v1107_v31, %v52_v46 }
  0xa3   :  { %v1280_v19 = vrot.slane %v1102_v29, %v52_v46  ;;  %v1283_v20 = vrot.slane %v1092_v27, %v52_v46  ;;  %v337_v27 = vld [vmem:[%s1500_s2] sm:$0xff] }
  0xa4   :  { %v77_v30 = vpop.permute.xlu1 %76  ;;  %411 = vmatpush1.msra.mxu0 %v140_v23  ;;  %481 = vmatprep.subr.mxu1 %v143_v25  ;;  %v75_v37 = vpop.permute.xlu0 %74 }
  0xa5   :  { %v85_v38 = vsel %vm82_vm6, %v75_v37, %v77_v30  ;;  %482 = vmatpush1.msra.mxu1 %v142_v24 }
  0xa6   :  { %v104_v40 = vmul.f32 %v1245_v26, %v85_v38 }
  0xa8   :  { %v81_v47 = vpop.permute.xlu1 %80  ;;  %412 = vmatprep.subr.mxu0 %v104_v40  ;;  %v79_v48 = vpop.permute.xlu0 %78 }
  0xa9   :  { %v86_v49 = vsel %vm82_vm6, %v81_v47, %v75_v37  ;;  %v83_v54 = vsel %vm82_vm6, %v79_v48, %v81_v47  ;;  %v84_v55 = vsel %vm82_vm6, %v77_v30, %v79_v48 }
  0xaa   :  { %v103_v56 = vmul.f32 %v1250_v39, %v86_v49  ;;  %v105_v57 = vmul.f32 %v1254_v42, %v84_v55  ;;  %v106_v13 = vmul.f32 %v1257_v45, %v83_v54 }
  0xac   :  { %v38_v60 = vpop.permute.xlu1 %37  ;;  %413 = vmatpush1.msra.mxu0 %v103_v56  ;;  %483 = vmatprep.subr.mxu1 %v106_v13  ;;  %v36_v61 = vpop.permute.xlu0 %35  ;;  %v731_v13 = vld [vmem:[%s1501_s5] sm:$0xff] }
  0xad   :  { %v48_v63 = vsel %vm45_vm7, %v36_v61, %v38_v60  ;;  %484 = vmatpush1.msra.mxu1 %v105_v57 }
  0xae   :  { %v67_v7 = vmul.f32 %v1271_v59, %v48_v63 }
  0xb0   :  { %v42_v28 = vpop.permute.xlu1 %41  ;;  %414 = vmatprep.subr.mxu0 %v67_v7  ;;  %v40_v21 = vpop.permute.xlu0 %39 }
  0xb1   :  { %v49_v22 = vsel %vm45_vm7, %v42_v28, %v36_v61  ;;  %v46_v23 = vsel %vm45_vm7, %v40_v21, %v42_v28  ;;  %v47_v24 = vsel %vm45_vm7, %v38_v60, %v40_v21 }
  0xb2   :  { %v66_v31 = vmul.f32 %v1277_v17, %v49_v22  ;;  %v68_v29 = vmul.f32 %v1280_v19, %v47_v24  ;;  %v69_v25 = vmul.f32 %v1283_v20, %v46_v23 }
  0xb4   :  { %415 = vmatpush1.msra.mxu0 %v66_v31  ;;  %485 = vmatprep.subr.mxu1 %v69_v25 }
  0xb5   :  { %902 = vmatmul.mubr.msk.f32.vlgmr.msra.gmra.mxu0 %vm380_vm8, %v337_v27  ;;  %486 = vmatpush1.msra.mxu1 %v68_v29 }
  0xb6   :  { %903 = vmatmul.mubr.msk.f32.vlgmr.msra.gmra.mxu1 %vm380_vm8, %v337_v27  ;;  %804 = vmatprep.mubr.f32.mxu0 %v924_v4 }
  0xb7   :  { %875 = vmatprep.mubr.f32.mxu1 %v924_v4 }
  0xbd   :  { %v378_v30 = vpop.permute.xlu0 %377 }
 0x175   :  { %v450_v37 = vpop.f32.mrf.mxu0 }
 0x176   :  { %v451_v38 = vadd.f32 %v450_v37, %v378_v30  ;;  %v521_v40 = vpop.f32.mrf.mxu1 }
 0x177   :  { %v522_v46 = vadd.f32 %v521_v40, %v378_v30  ;;  %v452_v47 = vpop.f32.mrf.mxu0 }
 0x178   :  { %v1301_v48 = vmax.f32 %v451_v38, 0.0  ;;  %v453_v49 = vadd.f32 %v452_v47, %v378_v30  ;;  %v523_v55 = vpop.f32.mrf.mxu1 }
 0x179   :  { %v1303_v54 = vmax.f32 %v522_v46, 0.0  ;;  %v524_v4 = vadd.f32 %v523_v55, %v378_v30 }
 0x17a   :  { %674 = vrot.lane.b32.xlu1 %v1301_v48, %s917_s25  ;;  %v1309_v56 = vmax.f32 %v453_v49, 0.0 }
 0x17b   :  { %678 = vrot.lane.b32.xlu0 %v1303_v54, %s917_s25  ;;  %v1315_v57 = vmax.f32 %v524_v4, 0.0 }
 0x17e   :  { %676 = vrot.lane.b32.xlu1 %v1309_v56, %s917_s25 }
 0x17f   :  { %654 = vrot.lane.b32.xlu0 %v1301_v48, %s918_s30 }
 0x182   :  { %680 = vrot.lane.b32.xlu1 %v1315_v57, %s917_s25 }
 0x183   :  { %658 = vrot.lane.b32.xlu0 %v1303_v54, %s918_s30 }
 0x186   :  { %656 = vrot.lane.b32.xlu1 %v1309_v56, %s918_s30 }
 0x187   :  { %634 = vrot.lane.b32.xlu0 %v1301_v48, %s919_s0 }
 0x18a   :  { %660 = vrot.lane.b32.xlu1 %v1315_v57, %s918_s30 }
 0x18b   :  { %638 = vrot.lane.b32.xlu0 %v1303_v54, %s919_s0 }
 0x18e   :  { %636 = vrot.lane.b32.xlu1 %v1309_v56, %s919_s0 }
 0x18f   :  { %614 = vrot.lane.b32.xlu0 %v1301_v48, %s920_s7 }
 0x192   :  { %640 = vrot.lane.b32.xlu1 %v1315_v57, %s919_s0 }
 0x193   :  { %618 = vrot.lane.b32.xlu0 %v1303_v54, %s920_s7 }
 0x196   :  { %616 = vrot.lane.b32.xlu1 %v1309_v56, %s920_s7 }
 0x197   :  { %590 = vrot.lane.b32.xlu0 %v1301_v48, %s921_s8 }
 0x19a   :  { %620 = vrot.lane.b32.xlu1 %v1315_v57, %s920_s7 }
 0x19b   :  { %594 = vrot.lane.b32.xlu0 %v1303_v54, %s921_s8 }
 0x19e   :  { %592 = vrot.lane.b32.xlu1 %v1309_v56, %s921_s8 }
 0x19f   :  { %570 = vrot.lane.b32.xlu0 %v1301_v48, %s922_s9 }
 0x1a2   :  { %596 = vrot.lane.b32.xlu1 %v1315_v57, %s921_s8 }
 0x1a3   :  { %574 = vrot.lane.b32.xlu0 %v1303_v54, %s922_s9 }
 0x1a6   :  { %572 = vrot.lane.b32.xlu1 %v1309_v56, %s922_s9 }
 0x1a7   :  { %550 = vrot.lane.b32.xlu0 %v1301_v48, %s923_s10 }
 0x1aa   :  { %576 = vrot.lane.b32.xlu1 %v1315_v57, %s922_s9 }
 0x1ab   :  { %554 = vrot.lane.b32.xlu0 %v1303_v54, %s923_s10 }
 0x1ae   :  { %552 = vrot.lane.b32.xlu1 %v1309_v56, %s923_s10 }
 0x1af   :  { %530 = vrot.lane.b32.xlu0 %v1301_v48, %s926_s11 }
 0x1b2   :  { %556 = vrot.lane.b32.xlu1 %v1315_v57, %s923_s10 }
 0x1b3   :  { %534 = vrot.lane.b32.xlu0 %v1303_v54, %s926_s11 }
 0x1b6   :  { %532 = vrot.lane.b32.xlu1 %v1309_v56, %s926_s11 }
 0x1b7   :  { %734 = vperm.xlu0 %916, %v731_v13  }
 0x1ba   :  { %536 = vrot.lane.b32.xlu1 %v1315_v57, %s926_s11 }
 0x1ec   :  { %v675_v60 = vpop.permute.xlu1 %674 }
 0x1ed   :  { %v679_v61 = vpop.permute.xlu0 %678 }
 0x1f0   :  { %v677_v63 = vpop.permute.xlu1 %676 }
 0x1f1   :  { %v683_v7 = vsel %vm308_vm0, %v677_v63, %v679_v61  ;;  %v684_v28 = vsel %vm308_vm0, %v675_v60, %v677_v63  ;;  %v655_v21 = vpop.permute.xlu0 %654 }
 0x1f2   :  { %v686_v22 = vmul.f32 %v1069_v14, %v684_v28  ;;  %v687_v23 = vmul.f32 %v1057_v11, %v683_v7 }
 0x1f4   :  { %754 = vmatprep.subr.mxu0 %v687_v23  ;;  %v681_v24 = vpop.permute.xlu1 %680 }
 0x1f5   :  { %v682_v31 = vsel %vm308_vm0, %v679_v61, %v681_v24  ;;  %v685_v29 = vsel %vm308_vm0, %v681_v24, %v675_v60  ;;  %v659_v25 = vpop.permute.xlu0 %658  ;;  %755 = vmatpush1.msra.mxu0 %v686_v22 }
 0x1f6   :  { %v688_v27 = vmul.f32 %v1074_v15, %v682_v31  ;;  %v689_v30 = vmul.f32 %v1062_v12, %v685_v29 }
 0x1f8   :  { %825 = vmatprep.subr.mxu1 %v689_v30  ;;  %v657_v37 = vpop.permute.xlu1 %656 }
 0x1f9   :  { %v663_v14 = vsel %vm271_vm1, %v657_v37, %v659_v25  ;;  %v664_v11 = vsel %vm271_vm1, %v655_v21, %v657_v37  ;;  %v635_v38 = vpop.permute.xlu0 %634  ;;  %826 = vmatpush1.msra.mxu1 %v688_v27 }
 0x1fa   :  { %v666_v40 = vmul.f32 %v664_v11, %v1120_v36  ;;  %v667_v46 = vmul.f32 %v663_v14, %v1114_v34 }
 0x1fc   :  { %756 = vmatprep.subr.mxu0 %v667_v46  ;;  %v661_v47 = vpop.permute.xlu1 %660 }
 0x1fd   :  { %v662_v15 = vsel %vm271_vm1, %v659_v25, %v661_v47  ;;  %v665_v12 = vsel %vm271_vm1, %v661_v47, %v655_v21  ;;  %v639_v49 = vpop.permute.xlu0 %638  ;;  %757 = vmatpush1.msra.mxu0 %v666_v40 }
 0x1fe   :  { %v668_v55 = vmul.f32 %v662_v15, %v1117_v35  ;;  %v669_v4 = vmul.f32 %v665_v12, %v1111_v33 }
 0x200   :  { %827 = vmatprep.subr.mxu1 %v669_v4  ;;  %v637_v13 = vpop.permute.xlu1 %636 }
 0x201   :  { %v643_v36 = vsel %vm234_vm2, %v637_v13, %v639_v49  ;;  %v644_v34 = vsel %vm234_vm2, %v635_v38, %v637_v13  ;;  %v615_v60 = vpop.permute.xlu0 %614  ;;  %828 = vmatpush1.msra.mxu1 %v668_v55 }
 0x202   :  { %v646_v61 = vmul.f32 %v644_v34, %v1146_v53  ;;  %v647_v63 = vmul.f32 %v643_v36, %v1140_v51 }
 0x204   :  { %758 = vmatprep.subr.mxu0 %v647_v63  ;;  %v641_v7 = vpop.permute.xlu1 %640 }
 0x205   :  { %v642_v35 = vsel %vm234_vm2, %v639_v49, %v641_v7  ;;  %v645_v33 = vsel %vm234_vm2, %v641_v7, %v635_v38  ;;  %v619_v28 = vpop.permute.xlu0 %618  ;;  %759 = vmatpush1.msra.mxu0 %v646_v61 }
 0x206   :  { %v648_v21 = vmul.f32 %v642_v35, %v1143_v52  ;;  %v649_v22 = vmul.f32 %v645_v33, %v1137_v50 }
 0x208   :  { %829 = vmatprep.subr.mxu1 %v649_v22  ;;  %v617_v23 = vpop.permute.xlu1 %616 }
 0x209   :  { %v623_v53 = vsel %vm197_vm3, %v617_v23, %v619_v28  ;;  %v624_v51 = vsel %vm197_vm3, %v615_v60, %v617_v23  ;;  %v591_v24 = vpop.permute.xlu0 %590  ;;  %830 = vmatpush1.msra.mxu1 %v648_v21 }
 0x20a   :  { %v626_v31 = vmul.f32 %v624_v51, %v1173_v18  ;;  %v627_v29 = vmul.f32 %v623_v53, %v1166_v10 }
 0x20c   :  { %760 = vmatprep.subr.mxu0 %v627_v29  ;;  %v621_v25 = vpop.permute.xlu1 %620 }
 0x20d   :  { %v622_v52 = vsel %vm197_vm3, %v619_v28, %v621_v25  ;;  %v625_v50 = vsel %vm197_vm3, %v621_v25, %v615_v60  ;;  %v595_v27 = vpop.permute.xlu0 %594  ;;  %761 = vmatpush1.msra.mxu0 %v626_v31 }
 0x20e   :  { %v628_v30 = vmul.f32 %v622_v52, %v1169_v16  ;;  %v629_v37 = vmul.f32 %v625_v50, %v1163_v9  ;;  %762 = vmatprep.subr.mxu0 %v1309_v56 }
 0x20f   :  { %763 = vmatpush1.msra.mxu0 %v1301_v48 }
 0x210   :  { %831 = vmatprep.subr.mxu1 %v629_v37  ;;  %v593_v10 = vpop.permute.xlu1 %592 }
 0x211   :  { %v600_v18 = vsel %vm156_vm4, %v591_v24, %v593_v10  ;;  %v571_v14 = vpop.permute.xlu0 %570  ;;  %832 = vmatpush1.msra.mxu1 %v628_v30  ;;  %v599_v9 = vsel %vm156_vm4, %v593_v10, %v595_v27 }
 0x212   :  { %v603_v11 = vmul.f32 %v600_v18, %v1188_v32  ;;  %833 = vmatprep.subr.mxu1 %v1315_v57  ;;  %v604_v57 = vmul.f32 %v599_v9, %v1199_v43 }
 0x213   :  { %834 = vmatpush1.msra.mxu1 %v1303_v54 }
 0x214   :  { %764 = vmatprep.subr.mxu0 %v603_v11  ;;  %v597_v16 = vpop.permute.xlu1 %596 }
 0x215   :  { %v598_v48 = vsel %vm156_vm4, %v595_v27, %v597_v16  ;;  %v601_v56 = vsel %vm156_vm4, %v597_v16, %v591_v24  ;;  %v575_v38 = vpop.permute.xlu0 %574 }
 0x216   :  { %v602_v40 = vmul.f32 %v601_v56, %v1194_v41  ;;  %v605_v32 = vmul.f32 %v598_v48, %v1202_v44 }
 0x218   :  { %765 = vmatpush1.msra.mxu0 %v602_v40  ;;  %835 = vmatprep.subr.mxu1 %v605_v32  ;;  %v573_v54 = vpop.permute.xlu1 %572 }
 0x219   :  { %v580_v46 = vsel %vm119_vm5, %v571_v14, %v573_v54  ;;  %v551_v47 = vpop.permute.xlu0 %550  ;;  %836 = vmatpush1.msra.mxu1 %v604_v57  ;;  %v579_v12 = vsel %vm119_vm5, %v573_v54, %v575_v38 }
 0x21a   :  { %v583_v15 = vmul.f32 %v580_v46, %v1219_v58  ;;  %v584_v4 = vmul.f32 %v579_v12, %v1228_v5 }
 0x21c   :  { %766 = vmatprep.subr.mxu0 %v583_v15  ;;  %v577_v49 = vpop.permute.xlu1 %576 }
 0x21d   :  { %v578_v41 = vsel %vm119_vm5, %v575_v38, %v577_v49  ;;  %v581_v43 = vsel %vm119_vm5, %v577_v49, %v571_v14  ;;  %v555_v13 = vpop.permute.xlu0 %554 }
 0x21e   :  { %v582_v44 = vmul.f32 %v581_v43, %v1224_v62  ;;  %v585_v55 = vmul.f32 %v578_v41, %v1231_v6 }
 0x220   :  { %767 = vmatpush1.msra.mxu0 %v582_v44  ;;  %837 = vmatprep.subr.mxu1 %v585_v55  ;;  %v553_v58 = vpop.permute.xlu1 %552 }
 0x221   :  { %v560_v36 = vsel %vm82_vm6, %v551_v47, %v553_v58  ;;  %838 = vmatpush1.msra.mxu1 %v584_v4  ;;  %v559_v60 = vsel %vm82_vm6, %v553_v58, %v555_v13  ;;  %v531_v62 = vpop.permute.xlu0 %530 }
 0x222   :  { %v563_v34 = vmul.f32 %v560_v36, %v1245_v26  ;;  %v564_v35 = vmul.f32 %v559_v60, %v1254_v42 }
 0x224   :  { %768 = vmatprep.subr.mxu0 %v563_v34  ;;  %v557_v61 = vpop.permute.xlu1 %556 }
 0x225   :  { %v558_v6 = vsel %vm82_vm6, %v555_v13, %v557_v61  ;;  %v561_v5 = vsel %vm82_vm6, %v557_v61, %v551_v47  ;;  %v535_v21 = vpop.permute.xlu0 %534 }
 0x226   :  { %v562_v63 = vmul.f32 %v561_v5, %v1250_v39  ;;  %v565_v7 = vmul.f32 %v558_v6, %v1257_v45 }
 0x228   :  { %769 = vmatpush1.msra.mxu0 %v562_v63  ;;  %839 = vmatprep.subr.mxu1 %v565_v7  ;;  %v533_v26 = vpop.permute.xlu1 %532 }
 0x229   :  { %v540_v33 = vsel %vm45_vm7, %v531_v62, %v533_v26  ;;  %840 = vmatpush1.msra.mxu1 %v564_v35  ;;  %v539_v22 = vsel %vm45_vm7, %v533_v26, %v535_v21 }
 0x22a   :  { %v543_v28 = vmul.f32 %v540_v33, %v1271_v59  ;;  %v694_v59 = vld [vmem:[%s1502_s4] sm:$0xff]  ;;  %v544_v51 = vmul.f32 %v539_v22, %v1280_v19 }
 0x22c   :  { %770 = vmatprep.subr.mxu0 %v543_v28  ;;  %v537_v23 = vpop.permute.xlu1 %536 }
 0x22d   :  { %v538_v39 = vsel %vm45_vm7, %v535_v21, %v537_v23  ;;  %v541_v42 = vsel %vm45_vm7, %v537_v23, %v531_v62 }
 0x22e   :  { %v542_v45 = vmul.f32 %v541_v42, %v1277_v17  ;;  %v545_v53 = vmul.f32 %v538_v39, %v1283_v20 }
 0x230   :  { %771 = vmatpush1.msra.mxu0 %v542_v45  ;;  %841 = vmatprep.subr.mxu1 %v545_v53 }
 0x231   :  { %904 = vmatmul.mubr.msk.f32.vlgmr.msra.gmra.mxu0 %vm380_vm8, %v694_v59  ;;  %842 = vmatpush1.msra.mxu1 %v544_v51 }
 0x232   :  { %905 = vmatmul.mubr.msk.f32.vlgmr.msra.gmra.mxu1 %vm380_vm8, %v694_v59  ;;  %v735_v24 = vpop.permute.xlu0 %734 }
 0x2f1   :  { %v806_v8 = vpop.f32.mrf.mxu0 }
 0x2f2   :  { %v807_v31 = vadd.f32 %v806_v8, %v735_v24  ;;  %v877_v29 = vpop.f32.mrf.mxu1 }
 0x2f3   :  { %v878_v17 = vadd.f32 %v877_v29, %v735_v24  ;;  %v808_v25 = vpop.f32.mrf.mxu0 }
 0x2f4   :  { %v882_v20 = vadd.f32 %v807_v31, %v970_v1  ;;  %v809_v52 = vadd.f32 %v808_v25, %v735_v24  ;;  %v879_v50 = vpop.f32.mrf.mxu1 }
 0x2f5   :  { %v884_v27 = vadd.f32 %v878_v17, %v965_v0  ;;  %v880_v19 = vadd.f32 %v879_v50, %v735_v24 }
 0x2f6   :  { %v886_v30 = vmax.f32 %v882_v20, 0.0  ;;  %v883_v37 = vadd.f32 %v809_v52, %v984_v3 }
 0x2f7   :  { %v888_v10 = vmax.f32 %v884_v27, 0.0  ;;  %v885_v18 = vadd.f32 %v880_v19, %v979_v2 }
 0x2f8   :  { %890 = vst [vmem:[%s1503_s6] sm:$0xff] %v886_v30  ;;  %v887_v14 = vmax.f32 %v883_v37, 0.0 }
 0x2f9   :  { %892 = vst [vmem:[%s1503_s6 + $0x10] sm:$0xff] %v888_v10  ;;  %v889_v1 = vmax.f32 %v885_v18, 0.0 }
 0x2fa   :  { %891 = vst [vmem:[%s1503_s6 + $0x8] sm:$0xff] %v887_v14 }
 0x2fb   :  { %893 = vst [vmem:[%s1503_s6 + $0x18] sm:$0xff] %v889_v1 }

</bundles_post_ra>
